<compile_context>
chip_gen: v7x
topology: tpu7x:2x2x1
jax: 0.10.0
libtpu: 0.0.40
codegen_flags: <defaults>
</compile_context>

<pallas_src>
import math

import jax
import jax.numpy as jnp
from jax.experimental import pallas as pl
from jax.experimental.pallas import tpu as pltpu

_LANES = 128
# Arrays at/above this size get >= 2 row tiles so the parallel grid axis can be
# sharded across v7x's two TensorCores (neutral on v5e/v6e).
_MIN_SPLIT_BYTES = 4 * 1024 * 1024


def _identity_kernel(x_ref, o_ref):
    # Pure pass-through: load the whole VMEM tile and store it to the output.
    o_ref[...] = x_ref[...]


def _device_budgets():
    """Return (target_block_bytes, vmem_limit_bytes) tuned per TPU generation."""
    try:
        vmem = pltpu.get_tpu_info().vmem_capacity_bytes
    except Exception:
        vmem = 64 * 1024 * 1024  # conservative (v7x-class) default
    if vmem <= 64 * 1024 * 1024:
        # v7x: 64 MiB physical VMEM.  8 MiB blocks -> 4 pipeline buffers ~32 MiB,
        # with headroom under a 40 MiB scoped limit.
        return 8 * 1024 * 1024, 40 * 1024 * 1024
    # v5e / v6e: 128 MiB VMEM.  Bigger blocks amortize the ~0.35 us/step cost.
    return 16 * 1024 * 1024, 80 * 1024 * 1024


def _choose_tile_rows(rows, itemsize, target_block_bytes, nbytes):
    """Row-tile size: byte-budgeted, multiple of 8 sublanes, >=2 tiles if big."""
    row_bytes = _LANES * itemsize
    budget_rows = max(8, (target_block_bytes // row_bytes) // 8 * 8)
    if nbytes >= _MIN_SPLIT_BYTES:
        # Force at least two row tiles so both v7x TensorCores get work.
        half_rows = ((rows + 1) // 2 + 7) // 8 * 8
        budget_rows = min(budget_rows, half_rows)
    if budget_rows >= rows:
        return rows  # full extent is always a legal block shape
    return budget_rows  # strict sub-tile: multiple of 8 sublanes


def base_model_forward(x: jax.Array, *, force_kernel: bool = False) -> jax.Array:
    """Pallas stand-in for BaseModel.forward (abstract) — identity.

    Default path (force_kernel=False): the identity is elided entirely — no
    kernel launch, no HBM traffic (the review's highest-value change).

    force_kernel=True: runs a lane-dense (rows, 128) tiled VMEM copy with
    input/output aliasing, sized by a per-generation byte budget.
    """
    if not force_kernel:
        return x

    orig_shape = x.shape
    total = math.prod(orig_shape) if orig_shape else 1
    if total == 0:
        return x

    # Always present a lane-dense (rows, 128) layout: pad odd element counts
    # to the next multiple of 128 so stores are full-width vst, then slice back.
    flat = x.reshape(total)
    padded = pl.cdiv(total, _LANES) * _LANES
    if padded != total:
        flat = jnp.pad(flat, (0, padded - total))
    x2d = flat.reshape(padded // _LANES, _LANES)

    rows = x2d.shape[0]
    itemsize = x2d.dtype.itemsize
    nbytes = padded * itemsize

    target_block_bytes, vmem_limit = _device_budgets()
    tile_rows = _choose_tile_rows(rows, itemsize, target_block_bytes, nbytes)
    grid = (pl.cdiv(rows, tile_rows),)

    out2d = pl.pallas_call(
        _identity_kernel,
        out_shape=jax.ShapeDtypeStruct((rows, _LANES), x2d.dtype),
        grid=grid,
        in_specs=[pl.BlockSpec((tile_rows, _LANES), lambda i: (i, 0))],
        out_specs=pl.BlockSpec((tile_rows, _LANES), lambda i: (i, 0)),
        # Identity: alias the output onto the (intermediate, donatable) input
        # buffer so no new HBM allocation is made for the result.
        input_output_aliases={0: 0},
        cost_estimate=pl.CostEstimate(
            flops=0,
            transcendentals=0,
            bytes_accessed=2 * nbytes,
        ),
        compiler_params=pltpu.CompilerParams(
            # Row tiles are independent -> shard across both TensorCores on v7x.
            dimension_semantics=("parallel",),
            vmem_limit_bytes=vmem_limit,
        ),
    )(x2d)

    out_flat = out2d.reshape(padded)
    if padded != total:
        out_flat = out_flat[:total]
    return out_flat.reshape(orig_shape)


if __name__ == "__main__":
    key = jax.random.PRNGKey(0)
    # Small NCHW input consistent with a conv-style model: batch=2, ch=4, 16x16.
    x = jax.random.normal(key, (2, 4, 16, 16), dtype=jnp.float32)

    # Exercise the Pallas kernel path once (lane-dense, tiled identity copy).
    y_kernel = base_model_forward(x, force_kernel=True)
    jax.block_until_ready(y_kernel)
    assert y_kernel.shape == x.shape
    assert jnp.array_equal(y_kernel, x)

    # Exercise the lane-padding path (element count not a multiple of 128).
    x_odd = jax.random.normal(jax.random.PRNGKey(0), (3, 5, 7), dtype=jnp.float32)
    y_odd = base_model_forward(x_odd, force_kernel=True)
    jax.block_until_ready(y_odd)
    assert y_odd.shape == x_odd.shape
    assert jnp.array_equal(y_odd, x_odd)

    # Default (recommended) path: identity is elided entirely — zero HBM traffic.
    y_fast = base_model_forward(x)
    jax.block_until_ready(y_fast)
    assert y_fast is x

    print("KERNEL_OK")
</pallas_src>

<mosaic_0001>
module attributes {stable_mosaic.version = 11 : i64} {
  func.func @_identity_kernel(%arg0: i32, %arg1: memref<16x128xf32, #tpu.memory_space<vmem>>, %arg2: memref<16x128xf32, #tpu.memory_space<vmem>>) attributes {dimension_semantics = [#tpu.dimension_semantics<parallel>], iteration_bounds = array<i64: 1>, scalar_prefetch = 0 : i64, scratch_operands = 0 : i64, tpu.core_type = #tpu.core_type<tc>, window_params = [{transform_indices = @transform_0, window_bounds = array<i64: 16, 128>}, {transform_indices = @transform_1, window_bounds = array<i64: 16, 128>}]} {
    %c0 = arith.constant 0 : index
    %c0_0 = arith.constant 0 : index
    %0 = vector.load %arg1[%c0, %c0_0] : memref<16x128xf32, #tpu.memory_space<vmem>>, vector<16x128xf32>
    %c0_1 = arith.constant 0 : index
    %c0_2 = arith.constant 0 : index
    %1 = vector.load %arg2[%c0_1, %c0_2] : memref<16x128xf32, #tpu.memory_space<vmem>>, vector<16x128xf32>
    tpu.vector_store %arg2[%c0_1, %c0_2], %0 {strides = array<i32>} : memref<16x128xf32, #tpu.memory_space<vmem>>, vector<16x128xf32>,
    return
  }
  func.func @transform_0(%arg0: i32) -> (i32, i32) {
    %c0_i32 = arith.constant 0 : i32
    %c0_i32_0 = arith.constant 0 : i32
    return %arg0, %c0_i32 : i32, i32
  }
  func.func @transform_1(%arg0: i32) -> (i32, i32) {
    %c0_i32 = arith.constant 0 : i32
    %c0_i32_0 = arith.constant 0 : i32
    return %arg0, %c0_i32 : i32, i32
  }
}

</mosaic_0001>

<bundles_post_ra>
// kernel: tpu_custom_call.1
= control target key start
LH: loop header
LB: loop body
LE: loop exit
PB: predicated region body
PF: predicated region fallthrough
CT: control target
= control target key end

     0   :  { %6 = vsyncpa [#allocation3], 0  ;;  %s134_s0 = inlined_call_operand.hbm [shape: f32[16,128], index: 0, kind: input, shape index: {}, may-alias: {0,1}]   ;;  %s135_s1 = inlined_call_operand.hbm [shape: f32[16,128], index: 1, kind: output, shape index: {}, may-alias: {0,1}]  }
   0x1   :  { %7 = vsyncpa [#allocation4], 0  ;;  %s96_s6 = smov [#allocation2]   ;;  %s48_s10 = scalar_lea.hbm %s134_s0, 256 }
   0x2   :  { %s13_s7 = sshll.u32 %s96_s6, 4  ;;  %p49_p0 = scmp.ne.s32.totalorder %s134_s0, %s48_s10  ;;  %s14_s7 = int_to_ptr.vmem [resolvable:$true] %s13_s7 }
   0x3   :  { %p52_p1 = scmp.lt.u32.totalorder %s48_s10, %s134_s0 }
   0x5   :  { %p54_p2 = pnand %p52_p1, %p49_p0 }
   0x7   :  { %57 = shalt.err (!%p54_p2)
}
   0x8   :  { %s58_s15 = scalar_lea.vmem %s14_s7, 256  ;;  %p63_p4 = scmp.lt.s32.totalorder %s14_s7, %s14_s7 }
   0x9   :  { %p59_p3 = scmp.ne.s32.totalorder %s14_s7, %s58_s15  ;;  %p64_p5 = scmp.lt.s32.totalorder %s58_s15, %s58_s15 }
   0xb   :  { %p65_p6 = por %p64_p5, %p63_p4 }
   0xd   :  { %p66_p7 = pnand %p65_p6, %p59_p3 }
   0xf   :  { %69 = shalt.err (!%p66_p7)
}
  0x10   :  { %s97_s16 = smov 128   ;;  %s98_s17 = smov 8  }
  0x11   :  { %19 = dma.hbm_to_vmem [thread:$0]  %s134_s0, 256, %s14_s7, [#allocation3], %s97_s16, %s97_s16, %s98_s17  }
  0x12   :  { %92 = dma.done.wait [#allocation3], 256  }
  0x13   :  { %93 = vsyncadd [#allocation3], 4294967040  ;;  %s99_s20 = smov [#allocation5]   ;;  %v23_v0 = vld [vmem:[#allocation2] sm:$0xff]  ;;  %v24_v1 = vld [vmem:[#allocation2 + $0x8] sm:$0xff] }
  0x14   :  { %s32_s21 = sshll.u32 %s99_s20, 4  ;;  %25 = vst [vmem:[#allocation5] sm:$0xff] %v23_v0  ;;  %26 = vst [vmem:[#allocation5 + $0x8] sm:$0xff] %v24_v1  ;;  %s33_s21 = int_to_ptr.vmem [resolvable:$true] %s32_s21 }
  0x15   :  { %s70_s22 = scalar_lea.vmem %s33_s21, 256  ;;  %p75_p9 = scmp.lt.s32.totalorder %s33_s21, %s33_s21 }
  0x16   :  { %p71_p8 = scmp.ne.s32.totalorder %s33_s21, %s70_s22  ;;  %p76_p10 = scmp.lt.s32.totalorder %s70_s22, %s70_s22 }
  0x18   :  { %p77_p11 = por %p76_p10, %p75_p9 }
  0x1a   :  { %p78_p12 = pnand %p77_p11, %p71_p8 }
  0x1c   :  { %81 = shalt.err (!%p78_p12)
}
  0x1d   :  { %s82_s0 = scalar_lea.hbm %s135_s1, 256 }
  0x1e   :  { %p83_p13 = scmp.ne.s32.totalorder %s135_s1, %s82_s0  ;;  %p86_p0 = scmp.lt.u32.totalorder %s82_s0, %s135_s1 }
  0x20   :  { %p88_p1 = pnand %p86_p0, %p83_p13 }
  0x22   :  { %91 = shalt.err (!%p88_p1)
}
  0x23   :  { %38 = dma.vmem_to_hbm [thread:$0]  %s33_s21, 256, %s135_s1, [#allocation4], %s97_s16, %s97_s16, %s98_s17  }
  0x24   :  { %94 = dma.done.wait [#allocation4], 256  }
  0x25   :  { %95 = vsyncadd [#allocation4], 4294967040 }
  0x26   :  { %42 = vsyncpa [#allocation3], 1 }
  0x27   :  { %43 = vsyncpa [#allocation4], 1 }

</bundles_post_ra>
